<compile_context>
chip_gen: v7x
topology: tpu7x:2x2x1
jax: 0.10.0
libtpu: 0.0.40
codegen_flags: <defaults>
</compile_context>

<pallas_src>
import functools

import jax
import jax.numpy as jnp
from jax import lax
from jax.experimental import pallas as pl
from jax.experimental.pallas import tpu as pltpu


def _fused_two_block_kernel(x_ref, w0_ref, w1_ref, shift0_ref, shift1_ref,
                            mask_ref, o_ref, xf1_ref, *, ksize, wp, lw, pad,
                            negative_slope):
    """Two fused [conv3x3 -> BN(eval) -> LeakyReLU] blocks for one batch image.

    x_ref:      (C_in,  (H+2p+1)*Wp)  zero-padded input, spatial dims flattened
    w0_ref:     (k*k, C_out, C_in)    conv0 weights (BN scale folded in)
    w1_ref:     (k*k, C_out, C_out)   conv1 weights (BN scale folded in)
    shift*_ref: (C_out, 1)            folded BN shift (beta - mean*scale)
    mask_ref:   (1, lw)               1.0 on valid output columns, 0.0 on the
                                      (Wp - W) junk columns of the padded grid
    o_ref:      (C_out, lw)           block-1 output on the padded-width grid
    xf1_ref:    (C_out, (H+2p+1)*Wp)  VMEM scratch: re-padded block-0 activation
    """

    def conv(src_ref, w_ref):
        # k x k conv, stride 1 == sum of k*k shifted (C_out, C) x (C, lw) matmuls.
        acc = None
        for dy in range(ksize):
            for dx in range(ksize):
                off = dy * wp + dx                       # static flat offset
                win = src_ref[:, off:off + lw]           # (C, lw) shifted window
                part = jnp.dot(w_ref[dy * ksize + dx], win,
                               preferred_element_type=jnp.float32)
                acc = part if acc is None else acc + part
        return acc

    def bn_lrelu(acc, shift_ref):
        y = acc + shift_ref[...]                          # BN (scale already in weights)
        return jnp.where(y > 0, y, negative_slope * y)    # LeakyReLU(0.01)

    # ---------------- block 0 ----------------
    y0 = bn_lrelu(conv(x_ref, w0_ref), shift0_ref)        # (C_out, lw)

    # Re-pad the block-0 activation inside VMEM for block 1: zero the scratch,
    # zero the junk columns of the padded-width grid, and drop the valid data
    # into the interior of the padded layout.
    xf1_ref[...] = jnp.zeros_like(xf1_ref)
    start = pad * wp + pad
    xf1_ref[:, start:start + lw] = y0 * mask_ref[...]

    # ---------------- block 1 ----------------
    y1 = bn_lrelu(conv(xf1_ref, w1_ref), shift1_ref)      # (C_out, lw)
    o_ref[...] = y1.astype(o_ref.dtype)                   # lane-dense store


def deconv_norm_activation(x, w0_folded, shift0, w1_folded, shift1,
                           *, kernel_size=3, stride=1, padding=1):
    """x: (N, C_in, H, W) float32 NCHW  ->  (N, C_out, H, W) float32 NCHW."""
    if stride != 1 or 2 * padding != kernel_size - 1:
        raise NotImplementedError("fused kernel assumes stride=1, 'same' padding")

    n, c_in, h, w = x.shape
    kk, c_out, _ = w0_folded.shape
    p = padding
    wp = w + 2 * p                     # padded row width (flat row stride)
    lp = (h + 2 * p + 1) * wp          # flat length incl. one extra guard row
    lw = h * wp                        # output length on the padded-width grid

    # Zero-pad spatially (+1 guard row at the bottom) and flatten (H, W).
    xpad = jnp.pad(x.astype(jnp.float32), ((0, 0), (0, 0), (p, p + 1), (p, p)))
    xf = xpad.reshape(n, c_in, lp)

    # Valid-column mask of the padded-width output grid (built once, tiny).
    col = jnp.arange(lw, dtype=jnp.int32) % wp
    mask = (col < w).astype(jnp.float32).reshape(1, lw)

    kernel = functools.partial(
        _fused_two_block_kernel, ksize=kernel_size, wp=wp, lw=lw, pad=p,
        negative_slope=0.01)

    # NOTE: operand order must match the kernel signature:
    #   (x, w0, w1, shift0, shift1, mask)
    out_flat = pl.pallas_call(
        kernel,
        out_shape=jax.ShapeDtypeStruct((n, c_out, lw), jnp.float32),
        grid_spec=pltpu.PrefetchScalarGridSpec(
            num_scalar_prefetch=0,
            grid=(n,),
            in_specs=[
                pl.BlockSpec((None, c_in, lp), lambda i: (i, 0, 0)),   # x
                pl.BlockSpec((kk, c_out, c_in), lambda i: (0, 0, 0)),  # w0
                pl.BlockSpec((kk, c_out, c_out), lambda i: (0, 0, 0)), # w1
                pl.BlockSpec((c_out, 1), lambda i: (0, 0)),            # shift0
                pl.BlockSpec((c_out, 1), lambda i: (0, 0)),            # shift1
                pl.BlockSpec((1, lw), lambda i: (0, 0)),               # mask
            ],
            out_specs=pl.BlockSpec((None, c_out, lw), lambda i: (i, 0, 0)),
            scratch_shapes=[pltpu.VMEM((c_out, lp), jnp.float32)],
        ),
        compiler_params=pltpu.CompilerParams(
            dimension_semantics=("parallel",)),
    )(xf, w0_folded, w1_folded, shift0, shift1, mask)

    # Drop the junk columns of the padded-width grid; layout is already NCHW.
    return out_flat.reshape(n, c_out, h, wp)[:, :, :, :w]


# ----------------------------- host-side parameter prep -----------------------------

def make_block_raw_params(key, c_in, c_out, k):
    k_w, k_g, k_b, k_m, k_v = jax.random.split(key, 5)
    weight = 0.1 * jax.random.normal(k_w, (c_out, c_in, k, k), jnp.float32)
    gamma = 1.0 + 0.1 * jax.random.normal(k_g, (c_out,), jnp.float32)
    beta = 0.1 * jax.random.normal(k_b, (c_out,), jnp.float32)
    running_mean = 0.05 * jax.random.normal(k_m, (c_out,), jnp.float32)
    running_var = 1.0 + 0.1 * jnp.abs(jax.random.normal(k_v, (c_out,), jnp.float32))
    return weight, gamma, beta, running_mean, running_var


def fold_block_params(weight_oihw, gamma, beta, running_mean, running_var, eps=1e-5):
    """Fold BN(eval) scale into the conv weights; return (k*k, C_out, C_in) + shift."""
    c_out, c_in, kh, kw = weight_oihw.shape
    scale = gamma / jnp.sqrt(running_var + eps)                  # (C_out,)
    shift = beta - running_mean * scale                          # (C_out,)
    w_scaled = weight_oihw * scale[:, None, None, None]
    w_folded = jnp.transpose(w_scaled, (2, 3, 0, 1)).reshape(kh * kw, c_out, c_in)
    return w_folded.astype(jnp.float32), shift.reshape(c_out, 1).astype(jnp.float32)


def _reference(x, raw_blocks, eps=1e-5, negative_slope=0.01):
    """Plain-JAX reference matching PyTorch eval-mode forward."""
    for weight, gamma, beta, mean, var in raw_blocks:
        y = lax.conv_general_dilated(
            x, weight, window_strides=(1, 1), padding=((1, 1), (1, 1)),
            dimension_numbers=("NCHW", "OIHW", "NCHW"),
            precision=lax.Precision.HIGHEST)
        scale = (gamma / jnp.sqrt(var + eps))[None, :, None, None]
        shift = (beta - mean * gamma / jnp.sqrt(var + eps))[None, :, None, None]
        y = y * scale + shift
        x = jnp.where(y > 0, y, negative_slope * y)
    return x


if __name__ == "__main__":
    # DeconvNormActivation(in_channels=4, out_channels=8, kernel_size=3,
    #                      stride=1, padding=1, num_blocks=2, bias=False)
    in_channels, out_channels = 4, 8
    kernel_size, stride, padding = 3, 1, 1

    key = jax.random.PRNGKey(0)
    k_x, k_b0, k_b1 = jax.random.split(key, 3)

    x = jax.random.normal(k_x, (2, in_channels, 16, 16), jnp.float32)

    raw_blocks = []
    for idx, k_blk in enumerate((k_b0, k_b1)):
        c_in = in_channels if idx == 0 else out_channels
        raw_blocks.append(make_block_raw_params(k_blk, c_in, out_channels, kernel_size))

    w0f, s0 = fold_block_params(*raw_blocks[0])
    w1f, s1 = fold_block_params(*raw_blocks[1])

    run = jax.jit(functools.partial(deconv_norm_activation,
                                    kernel_size=kernel_size, stride=stride,
                                    padding=padding))
    out = jax.block_until_ready(run(x, w0f, s0, w1f, s1))

    assert out.shape == (2, out_channels, 16, 16), out.shape
    assert out.dtype == jnp.float32

    ref = _reference(x, raw_blocks)
    max_err = float(jnp.max(jnp.abs(out - ref)))
    # Loose bound: tolerates MXU f32 (multi-pass bf16) rounding, catches any
    # indexing / layout bug (which would produce O(1) errors).
    assert max_err < 5e-2, f"max abs error vs reference: {max_err}"

    print("KERNEL_OK")
</pallas_src>

<mosaic_0001>
module attributes {stable_mosaic.version = 11 : i64} {
  func.func @_fused_two_block_kernel(%arg0: i32, %arg1: memref<1x4x342xf32, #tpu.memory_space<vmem>>, %arg2: memref<9x8x4xf32, #tpu.memory_space<vmem>>, %arg3: memref<9x8x8xf32, #tpu.memory_space<vmem>>, %arg4: memref<8x1xf32, #tpu.memory_space<vmem>>, %arg5: memref<8x1xf32, #tpu.memory_space<vmem>>, %arg6: memref<1x288xf32, #tpu.memory_space<vmem>>, %arg7: memref<1x8x288xf32, #tpu.memory_space<vmem>>, %arg8: memref<8x342xf32, #tpu.memory_space<vmem>>) attributes {dimension_semantics = [#tpu.dimension_semantics<parallel>], iteration_bounds = array<i64: 2>, scalar_prefetch = 0 : i64, scratch_operands = 1 : i64, tpu.core_type = #tpu.core_type<tc>, window_params = [{transform_indices = @transform_0, window_bounds = array<i64: 1, 4, 342>}, {pipeline_mode = #tpu.pipeline_mode<synchronous>, transform_indices = @transform_1, window_bounds = array<i64: 9, 8, 4>}, {pipeline_mode = #tpu.pipeline_mode<synchronous>, transform_indices = @transform_2, window_bounds = array<i64: 9, 8, 8>}, {pipeline_mode = #tpu.pipeline_mode<synchronous>, transform_indices = @transform_3, window_bounds = array<i64: 8, 1>}, {pipeline_mode = #tpu.pipeline_mode<synchronous>, transform_indices = @transform_4, window_bounds = array<i64: 8, 1>}, {pipeline_mode = #tpu.pipeline_mode<synchronous>, transform_indices = @transform_5, window_bounds = array<i64: 1, 288>}, {transform_indices = @transform_6, window_bounds = array<i64: 1, 8, 288>}]} {
    %c0 = arith.constant 0 : index
    %c0_0 = arith.constant 0 : index
    %c0_1 = arith.constant 0 : index
    %0 = vector.load %arg1[%c0, %c0_0, %c0_1] : memref<1x4x342xf32, #tpu.memory_space<vmem>>, vector<1x4x288xf32>
    %1 = vector.shape_cast %0 : vector<1x4x288xf32> to vector<4x288xf32>
    %c0_2 = arith.constant 0 : index
    %c0_3 = arith.constant 0 : index
    %c0_4 = arith.constant 0 : index
    %2 = vector.load %arg2[%c0_2, %c0_3, %c0_4] : memref<9x8x4xf32, #tpu.memory_space<vmem>>, vector<1x8x4xf32>
    %3 = vector.shape_cast %2 : vector<1x8x4xf32> to vector<8x4xf32>
    %cst = arith.constant dense<0.000000e+00> : vector<8x288xf32>
    %4 = tpu.matmul %3, %1, %cst {dimension_numbers = #tpu.dot_dimension_numbers<[1], [0], [0], [1], [0, 0, 1, 1], [], []>} : vector<8x4xf32>, vector<4x288xf32>, vector<8x288xf32> -> vector<8x288xf32>
    %c0_5 = arith.constant 0 : index
    %c0_6 = arith.constant 0 : index
    %c1 = arith.constant 1 : index
    %5 = vector.load %arg1[%c0_5, %c0_6, %c1] : memref<1x4x342xf32, #tpu.memory_space<vmem>>, vector<1x4x288xf32>
    %6 = vector.shape_cast %5 : vector<1x4x288xf32> to vector<4x288xf32>
    %c1_7 = arith.constant 1 : index
    %c0_8 = arith.constant 0 : index
    %c0_9 = arith.constant 0 : index
    %7 = vector.load %arg2[%c1_7, %c0_8, %c0_9] : memref<9x8x4xf32, #tpu.memory_space<vmem>>, vector<1x8x4xf32>
    %8 = vector.shape_cast %7 : vector<1x8x4xf32> to vector<8x4xf32>
    %cst_10 = arith.constant dense<0.000000e+00> : vector<8x288xf32>
    %9 = tpu.matmul %8, %6, %cst_10 {dimension_numbers = #tpu.dot_dimension_numbers<[1], [0], [0], [1], [0, 0, 1, 1], [], []>} : vector<8x4xf32>, vector<4x288xf32>, vector<8x288xf32> -> vector<8x288xf32>
    %10 = arith.addf %4, %9 : vector<8x288xf32>
    %c0_11 = arith.constant 0 : index
    %c0_12 = arith.constant 0 : index
    %c2 = arith.constant 2 : index
    %11 = vector.load %arg1[%c0_11, %c0_12, %c2] : memref<1x4x342xf32, #tpu.memory_space<vmem>>, vector<1x4x288xf32>
    %12 = vector.shape_cast %11 : vector<1x4x288xf32> to vector<4x288xf32>
    %c2_13 = arith.constant 2 : index
    %c0_14 = arith.constant 0 : index
    %c0_15 = arith.constant 0 : index
    %13 = vector.load %arg2[%c2_13, %c0_14, %c0_15] : memref<9x8x4xf32, #tpu.memory_space<vmem>>, vector<1x8x4xf32>
    %14 = vector.shape_cast %13 : vector<1x8x4xf32> to vector<8x4xf32>
    %cst_16 = arith.constant dense<0.000000e+00> : vector<8x288xf32>
    %15 = tpu.matmul %14, %12, %cst_16 {dimension_numbers = #tpu.dot_dimension_numbers<[1], [0], [0], [1], [0, 0, 1, 1], [], []>} : vector<8x4xf32>, vector<4x288xf32>, vector<8x288xf32> -> vector<8x288xf32>
    %16 = arith.addf %10, %15 : vector<8x288xf32>
    %c0_17 = arith.constant 0 : index
    %c0_18 = arith.constant 0 : index
    %c18 = arith.constant 18 : index
    %17 = vector.load %arg1[%c0_17, %c0_18, %c18] : memref<1x4x342xf32, #tpu.memory_space<vmem>>, vector<1x4x288xf32>
    %18 = vector.shape_cast %17 : vector<1x4x288xf32> to vector<4x288xf32>
    %c3 = arith.constant 3 : index
    %c0_19 = arith.constant 0 : index
    %c0_20 = arith.constant 0 : index
    %19 = vector.load %arg2[%c3, %c0_19, %c0_20] : memref<9x8x4xf32, #tpu.memory_space<vmem>>, vector<1x8x4xf32>
    %20 = vector.shape_cast %19 : vector<1x8x4xf32> to vector<8x4xf32>
    %cst_21 = arith.constant dense<0.000000e+00> : vector<8x288xf32>
    %21 = tpu.matmul %20, %18, %cst_21 {dimension_numbers = #tpu.dot_dimension_numbers<[1], [0], [0], [1], [0, 0, 1, 1], [], []>} : vector<8x4xf32>, vector<4x288xf32>, vector<8x288xf32> -> vector<8x288xf32>
    %22 = arith.addf %16, %21 : vector<8x288xf32>
    %c0_22 = arith.constant 0 : index
    %c0_23 = arith.constant 0 : index
    %c19 = arith.constant 19 : index
    %23 = vector.load %arg1[%c0_22, %c0_23, %c19] : memref<1x4x342xf32, #tpu.memory_space<vmem>>, vector<1x4x288xf32>
    %24 = vector.shape_cast %23 : vector<1x4x288xf32> to vector<4x288xf32>
    %c4 = arith.constant 4 : index
    %c0_24 = arith.constant 0 : index
    %c0_25 = arith.constant 0 : index
    %25 = vector.load %arg2[%c4, %c0_24, %c0_25] : memref<9x8x4xf32, #tpu.memory_space<vmem>>, vector<1x8x4xf32>
    %26 = vector.shape_cast %25 : vector<1x8x4xf32> to vector<8x4xf32>
    %cst_26 = arith.constant dense<0.000000e+00> : vector<8x288xf32>
    %27 = tpu.matmul %26, %24, %cst_26 {dimension_numbers = #tpu.dot_dimension_numbers<[1], [0], [0], [1], [0, 0, 1, 1], [], []>} : vector<8x4xf32>, vector<4x288xf32>, vector<8x288xf32> -> vector<8x288xf32>
    %28 = arith.addf %22, %27 : vector<8x288xf32>
    %c0_27 = arith.constant 0 : index
    %c0_28 = arith.constant 0 : index
    %c20 = arith.constant 20 : index
    %29 = vector.load %arg1[%c0_27, %c0_28, %c20] : memref<1x4x342xf32, #tpu.memory_space<vmem>>, vector<1x4x288xf32>
    %30 = vector.shape_cast %29 : vector<1x4x288xf32> to vector<4x288xf32>
    %c5 = arith.constant 5 : index
    %c0_29 = arith.constant 0 : index
    %c0_30 = arith.constant 0 : index
    %31 = vector.load %arg2[%c5, %c0_29, %c0_30] : memref<9x8x4xf32, #tpu.memory_space<vmem>>, vector<1x8x4xf32>
    %32 = vector.shape_cast %31 : vector<1x8x4xf32> to vector<8x4xf32>
    %cst_31 = arith.constant dense<0.000000e+00> : vector<8x288xf32>
    %33 = tpu.matmul %32, %30, %cst_31 {dimension_numbers = #tpu.dot_dimension_numbers<[1], [0], [0], [1], [0, 0, 1, 1], [], []>} : vector<8x4xf32>, vector<4x288xf32>, vector<8x288xf32> -> vector<8x288xf32>
    %34 = arith.addf %28, %33 : vector<8x288xf32>
    %c0_32 = arith.constant 0 : index
    %c0_33 = arith.constant 0 : index
    %c36 = arith.constant 36 : index
    %35 = vector.load %arg1[%c0_32, %c0_33, %c36] : memref<1x4x342xf32, #tpu.memory_space<vmem>>, vector<1x4x288xf32>
    %36 = vector.shape_cast %35 : vector<1x4x288xf32> to vector<4x288xf32>
    %c6 = arith.constant 6 : index
    %c0_34 = arith.constant 0 : index
    %c0_35 = arith.constant 0 : index
    %37 = vector.load %arg2[%c6, %c0_34, %c0_35] : memref<9x8x4xf32, #tpu.memory_space<vmem>>, vector<1x8x4xf32>
    %38 = vector.shape_cast %37 : vector<1x8x4xf32> to vector<8x4xf32>
    %cst_36 = arith.constant dense<0.000000e+00> : vector<8x288xf32>
    %39 = tpu.matmul %38, %36, %cst_36 {dimension_numbers = #tpu.dot_dimension_numbers<[1], [0], [0], [1], [0, 0, 1, 1], [], []>} : vector<8x4xf32>, vector<4x288xf32>, vector<8x288xf32> -> vector<8x288xf32>
    %40 = arith.addf %34, %39 : vector<8x288xf32>
    %c0_37 = arith.constant 0 : index
    %c0_38 = arith.constant 0 : index
    %c37 = arith.constant 37 : index
    %41 = vector.load %arg1[%c0_37, %c0_38, %c37] : memref<1x4x342xf32, #tpu.memory_space<vmem>>, vector<1x4x288xf32>
    %42 = vector.shape_cast %41 : vector<1x4x288xf32> to vector<4x288xf32>
    %c7 = arith.constant 7 : index
    %c0_39 = arith.constant 0 : index
    %c0_40 = arith.constant 0 : index
    %43 = vector.load %arg2[%c7, %c0_39, %c0_40] : memref<9x8x4xf32, #tpu.memory_space<vmem>>, vector<1x8x4xf32>
    %44 = vector.shape_cast %43 : vector<1x8x4xf32> to vector<8x4xf32>
    %cst_41 = arith.constant dense<0.000000e+00> : vector<8x288xf32>
    %45 = tpu.matmul %44, %42, %cst_41 {dimension_numbers = #tpu.dot_dimension_numbers<[1], [0], [0], [1], [0, 0, 1, 1], [], []>} : vector<8x4xf32>, vector<4x288xf32>, vector<8x288xf32> -> vector<8x288xf32>
    %46 = arith.addf %40, %45 : vector<8x288xf32>
    %c0_42 = arith.constant 0 : index
    %c0_43 = arith.constant 0 : index
    %c38 = arith.constant 38 : index
    %47 = vector.load %arg1[%c0_42, %c0_43, %c38] : memref<1x4x342xf32, #tpu.memory_space<vmem>>, vector<1x4x288xf32>
    %48 = vector.shape_cast %47 : vector<1x4x288xf32> to vector<4x288xf32>
    %c8 = arith.constant 8 : index
    %c0_44 = arith.constant 0 : index
    %c0_45 = arith.constant 0 : index
    %49 = vector.load %arg2[%c8, %c0_44, %c0_45] : memref<9x8x4xf32, #tpu.memory_space<vmem>>, vector<1x8x4xf32>
    %50 = vector.shape_cast %49 : vector<1x8x4xf32> to vector<8x4xf32>
    %cst_46 = arith.constant dense<0.000000e+00> : vector<8x288xf32>
    %51 = tpu.matmul %50, %48, %cst_46 {dimension_numbers = #tpu.dot_dimension_numbers<[1], [0], [0], [1], [0, 0, 1, 1], [], []>} : vector<8x4xf32>, vector<4x288xf32>, vector<8x288xf32> -> vector<8x288xf32>
    %52 = arith.addf %46, %51 : vector<8x288xf32>
    %c0_47 = arith.constant 0 : index
    %c0_48 = arith.constant 0 : index
    %53 = vector.load %arg4[%c0_47, %c0_48] : memref<8x1xf32, #tpu.memory_space<vmem>>, vector<8x1xf32>
    %54 = vector.broadcast %53 : vector<8x1xf32> to vector<8x288xf32>
    %55 = arith.addf %52, %54 : vector<8x288xf32>
    %cst_49 = arith.constant 0.000000e+00 : f32
    %56 = vector.broadcast %cst_49 : f32 to vector<8x288xf32>
    %57 = arith.cmpf ogt, %55, %56 : vector<8x288xf32>
    %cst_50 = arith.constant 0.00999999977 : f32
    %58 = vector.broadcast %cst_50 : f32 to vector<8x288xf32>
    %59 = arith.mulf %58, %55 : vector<8x288xf32>
    %60 = arith.select %57, %55, %59 : vector<8x288xi1>, vector<8x288xf32>
    %cst_51 = arith.constant 0.000000e+00 : f32
    %61 = vector.broadcast %cst_51 : f32 to vector<8x342xf32>
    %c0_52 = arith.constant 0 : index
    %c0_53 = arith.constant 0 : index
    %62 = vector.load %arg8[%c0_52, %c0_53] : memref<8x342xf32, #tpu.memory_space<vmem>>, vector<8x342xf32>
    tpu.vector_store %arg8[%c0_52, %c0_53], %61 {strides = array<i32>} : memref<8x342xf32, #tpu.memory_space<vmem>>, vector<8x342xf32>,
    %c0_54 = arith.constant 0 : index
    %c0_55 = arith.constant 0 : index
    %63 = vector.load %arg6[%c0_54, %c0_55] : memref<1x288xf32, #tpu.memory_space<vmem>>, vector<1x288xf32>
    %64 = vector.broadcast %63 : vector<1x288xf32> to vector<8x288xf32>
    %65 = arith.mulf %60, %64 : vector<8x288xf32>
    %c0_56 = arith.constant 0 : index
    %c19_57 = arith.constant 19 : index
    %66 = vector.load %arg8[%c0_56, %c19_57] : memref<8x342xf32, #tpu.memory_space<vmem>>, vector<8x288xf32>
    tpu.vector_store %arg8[%c0_56, %c19_57], %65 {strides = array<i32>} : memref<8x342xf32, #tpu.memory_space<vmem>>, vector<8x288xf32>,
    %c0_58 = arith.constant 0 : index
    %c0_59 = arith.constant 0 : index
    %67 = vector.load %arg8[%c0_58, %c0_59] : memref<8x342xf32, #tpu.memory_space<vmem>>, vector<8x288xf32>
    %c0_60 = arith.constant 0 : index
    %c0_61 = arith.constant 0 : index
    %c0_62 = arith.constant 0 : index
    %68 = vector.load %arg3[%c0_60, %c0_61, %c0_62] : memref<9x8x8xf32, #tpu.memory_space<vmem>>, vector<1x8x8xf32>
    %69 = vector.shape_cast %68 : vector<1x8x8xf32> to vector<8x8xf32>
    %cst_63 = arith.constant dense<0.000000e+00> : vector<8x288xf32>
    %70 = tpu.matmul %69, %67, %cst_63 {dimension_numbers = #tpu.dot_dimension_numbers<[1], [0], [0], [1], [0, 0, 1, 1], [], []>} : vector<8x8xf32>, vector<8x288xf32>, vector<8x288xf32> -> vector<8x288xf32>
    %c0_64 = arith.constant 0 : index
    %c1_65 = arith.constant 1 : index
    %71 = vector.load %arg8[%c0_64, %c1_65] : memref<8x342xf32, #tpu.memory_space<vmem>>, vector<8x288xf32>
    %c1_66 = arith.constant 1 : index
    %c0_67 = arith.constant 0 : index
    %c0_68 = arith.constant 0 : index
    %72 = vector.load %arg3[%c1_66, %c0_67, %c0_68] : memref<9x8x8xf32, #tpu.memory_space<vmem>>, vector<1x8x8xf32>
    %73 = vector.shape_cast %72 : vector<1x8x8xf32> to vector<8x8xf32>
    %cst_69 = arith.constant dense<0.000000e+00> : vector<8x288xf32>
    %74 = tpu.matmul %73, %71, %cst_69 {dimension_numbers = #tpu.dot_dimension_numbers<[1], [0], [0], [1], [0, 0, 1, 1], [], []>} : vector<8x8xf32>, vector<8x288xf32>, vector<8x288xf32> -> vector<8x288xf32>
    %75 = arith.addf %70, %74 : vector<8x288xf32>
    %c0_70 = arith.constant 0 : index
    %c2_71 = arith.constant 2 : index
    %76 = vector.load %arg8[%c0_70, %c2_71] : memref<8x342xf32, #tpu.memory_space<vmem>>, vector<8x288xf32>
    %c2_72 = arith.constant 2 : index
    %c0_73 = arith.constant 0 : index
    %c0_74 = arith.constant 0 : index
    %77 = vector.load %arg3[%c2_72, %c0_73, %c0_74] : memref<9x8x8xf32, #tpu.memory_space<vmem>>, vector<1x8x8xf32>
    %78 = vector.shape_cast %77 : vector<1x8x8xf32> to vector<8x8xf32>
    %cst_75 = arith.constant dense<0.000000e+00> : vector<8x288xf32>
    %79 = tpu.matmul %78, %76, %cst_75 {dimension_numbers = #tpu.dot_dimension_numbers<[1], [0], [0], [1], [0, 0, 1, 1], [], []>} : vector<8x8xf32>, vector<8x288xf32>, vector<8x288xf32> -> vector<8x288xf32>
    %80 = arith.addf %75, %79 : vector<8x288xf32>
    %c0_76 = arith.constant 0 : index
    %c18_77 = arith.constant 18 : index
    %81 = vector.load %arg8[%c0_76, %c18_77] : memref<8x342xf32, #tpu.memory_space<vmem>>, vector<8x288xf32>
    %c3_78 = arith.constant 3 : index
    %c0_79 = arith.constant 0 : index
    %c0_80 = arith.constant 0 : index
    %82 = vector.load %arg3[%c3_78, %c0_79, %c0_80] : memref<9x8x8xf32, #tpu.memory_space<vmem>>, vector<1x8x8xf32>
    %83 = vector.shape_cast %82 : vector<1x8x8xf32> to vector<8x8xf32>
    %cst_81 = arith.constant dense<0.000000e+00> : vector<8x288xf32>
    %84 = tpu.matmul %83, %81, %cst_81 {dimension_numbers = #tpu.dot_dimension_numbers<[1], [0], [0], [1], [0, 0, 1, 1], [], []>} : vector<8x8xf32>, vector<8x288xf32>, vector<8x288xf32> -> vector<8x288xf32>
    %85 = arith.addf %80, %84 : vector<8x288xf32>
    %c0_82 = arith.constant 0 : index
    %c19_83 = arith.constant 19 : index
    %86 = vector.load %arg8[%c0_82, %c19_83] : memref<8x342xf32, #tpu.memory_space<vmem>>, vector<8x288xf32>
    %c4_84 = arith.constant 4 : index
    %c0_85 = arith.constant 0 : index
    %c0_86 = arith.constant 0 : index
    %87 = vector.load %arg3[%c4_84, %c0_85, %c0_86] : memref<9x8x8xf32, #tpu.memory_space<vmem>>, vector<1x8x8xf32>
    %88 = vector.shape_cast %87 : vector<1x8x8xf32> to vector<8x8xf32>
    %cst_87 = arith.constant dense<0.000000e+00> : vector<8x288xf32>
    %89 = tpu.matmul %88, %86, %cst_87 {dimension_numbers = #tpu.dot_dimension_numbers<[1], [0], [0], [1], [0, 0, 1, 1], [], []>} : vector<8x8xf32>, vector<8x288xf32>, vector<8x288xf32> -> vector<8x288xf32>
    %90 = arith.addf %85, %89 : vector<8x288xf32>
    %c0_88 = arith.constant 0 : index
    %c20_89 = arith.constant 20 : index
    %91 = vector.load %arg8[%c0_88, %c20_89] : memref<8x342xf32, #tpu.memory_space<vmem>>, vector<8x288xf32>
    %c5_90 = arith.constant 5 : index
    %c0_91 = arith.constant 0 : index
    %c0_92 = arith.constant 0 : index
    %92 = vector.load %arg3[%c5_90, %c0_91, %c0_92] : memref<9x8x8xf32, #tpu.memory_space<vmem>>, vector<1x8x8xf32>
    %93 = vector.shape_cast %92 : vector<1x8x8xf32> to vector<8x8xf32>
    %cst_93 = arith.constant dense<0.000000e+00> : vector<8x288xf32>
    %94 = tpu.matmul %93, %91, %cst_93 {dimension_numbers = #tpu.dot_dimension_numbers<[1], [0], [0], [1], [0, 0, 1, 1], [], []>} : vector<8x8xf32>, vector<8x288xf32>, vector<8x288xf32> -> vector<8x288xf32>
    %95 = arith.addf %90, %94 : vector<8x288xf32>
    %c0_94 = arith.constant 0 : index
    %c36_95 = arith.constant 36 : index
    %96 = vector.load %arg8[%c0_94, %c36_95] : memref<8x342xf32, #tpu.memory_space<vmem>>, vector<8x288xf32>
    %c6_96 = arith.constant 6 : index
    %c0_97 = arith.constant 0 : index
    %c0_98 = arith.constant 0 : index
    %97 = vector.load %arg3[%c6_96, %c0_97, %c0_98] : memref<9x8x8xf32, #tpu.memory_space<vmem>>, vector<1x8x8xf32>
    %98 = vector.shape_cast %97 : vector<1x8x8xf32> to vector<8x8xf32>
    %cst_99 = arith.constant dense<0.000000e+00> : vector<8x288xf32>
    %99 = tpu.matmul %98, %96, %cst_99 {dimension_numbers = #tpu.dot_dimension_numbers<[1], [0], [0], [1], [0, 0, 1, 1], [], []>} : vector<8x8xf32>, vector<8x288xf32>, vector<8x288xf32> -> vector<8x288xf32>
    %100 = arith.addf %95, %99 : vector<8x288xf32>
    %c0_100 = arith.constant 0 : index
    %c37_101 = arith.constant 37 : index
    %101 = vector.load %arg8[%c0_100, %c37_101] : memref<8x342xf32, #tpu.memory_space<vmem>>, vector<8x288xf32>
    %c7_102 = arith.constant 7 : index
    %c0_103 = arith.constant 0 : index
    %c0_104 = arith.constant 0 : index
    %102 = vector.load %arg3[%c7_102, %c0_103, %c0_104] : memref<9x8x8xf32, #tpu.memory_space<vmem>>, vector<1x8x8xf32>
    %103 = vector.shape_cast %102 : vector<1x8x8xf32> to vector<8x8xf32>
    %cst_105 = arith.constant dense<0.000000e+00> : vector<8x288xf32>
    %104 = tpu.matmul %103, %101, %cst_105 {dimension_numbers = #tpu.dot_dimension_numbers<[1], [0], [0], [1], [0, 0, 1, 1], [], []>} : vector<8x8xf32>, vector<8x288xf32>, vector<8x288xf32> -> vector<8x288xf32>
    %105 = arith.addf %100, %104 : vector<8x288xf32>
    %c0_106 = arith.constant 0 : index
    %c38_107 = arith.constant 38 : index
    %106 = vector.load %arg8[%c0_106, %c38_107] : memref<8x342xf32, #tpu.memory_space<vmem>>, vector<8x288xf32>
    %c8_108 = arith.constant 8 : index
    %c0_109 = arith.constant 0 : index
    %c0_110 = arith.constant 0 : index
    %107 = vector.load %arg3[%c8_108, %c0_109, %c0_110] : memref<9x8x8xf32, #tpu.memory_space<vmem>>, vector<1x8x8xf32>
    %108 = vector.shape_cast %107 : vector<1x8x8xf32> to vector<8x8xf32>
    %cst_111 = arith.constant dense<0.000000e+00> : vector<8x288xf32>
    %109 = tpu.matmul %108, %106, %cst_111 {dimension_numbers = #tpu.dot_dimension_numbers<[1], [0], [0], [1], [0, 0, 1, 1], [], []>} : vector<8x8xf32>, vector<8x288xf32>, vector<8x288xf32> -> vector<8x288xf32>
    %110 = arith.addf %105, %109 : vector<8x288xf32>
    %c0_112 = arith.constant 0 : index
    %c0_113 = arith.constant 0 : index
    %111 = vector.load %arg5[%c0_112, %c0_113] : memref<8x1xf32, #tpu.memory_space<vmem>>, vector<8x1xf32>
    %112 = vector.broadcast %111 : vector<8x1xf32> to vector<8x288xf32>
    %113 = arith.addf %110, %112 : vector<8x288xf32>
    %cst_114 = arith.constant 0.000000e+00 : f32
    %114 = vector.broadcast %cst_114 : f32 to vector<8x288xf32>
    %115 = arith.cmpf ogt, %113, %114 : vector<8x288xf32>
    %cst_115 = arith.constant 0.00999999977 : f32
    %116 = vector.broadcast %cst_115 : f32 to vector<8x288xf32>
    %117 = arith.mulf %116, %113 : vector<8x288xf32>
    %118 = arith.select %115, %113, %117 : vector<8x288xi1>, vector<8x288xf32>
    %c0_116 = arith.constant 0 : index
    %c0_117 = arith.constant 0 : index
    %c0_118 = arith.constant 0 : index
    %119 = vector.load %arg7[%c0_116, %c0_117, %c0_118] : memref<1x8x288xf32, #tpu.memory_space<vmem>>, vector<1x8x288xf32>
    %120 = vector.shape_cast %119 : vector<1x8x288xf32> to vector<8x288xf32>
    %121 = vector.shape_cast %118 : vector<8x288xf32> to vector<1x8x288xf32>
    tpu.vector_store %arg7[%c0_116, %c0_117, %c0_118], %121 {strides = array<i32>} : memref<1x8x288xf32, #tpu.memory_space<vmem>>, vector<1x8x288xf32>,
    return
  }
  func.func @transform_0(%arg0: i32) -> (i32, i32, i32) {
    %c0_i32 = arith.constant 0 : i32
    %c0_i32_0 = arith.constant 0 : i32
    %c0_i32_1 = arith.constant 0 : i32
    return %arg0, %c0_i32, %c0_i32_0 : i32, i32, i32
  }
  func.func @transform_1(%arg0: i32) -> (i32, i32, i32) {
    %c0_i32 = arith.constant 0 : i32
    %c0_i32_0 = arith.constant 0 : i32
    %c0_i32_1 = arith.constant 0 : i32
    %c0_i32_2 = arith.constant 0 : i32
    return %c0_i32, %c0_i32_0, %c0_i32_1 : i32, i32, i32
  }
  func.func @transform_2(%arg0: i32) -> (i32, i32, i32) {
    %c0_i32 = arith.constant 0 : i32
    %c0_i32_0 = arith.constant 0 : i32
    %c0_i32_1 = arith.constant 0 : i32
    %c0_i32_2 = arith.constant 0 : i32
    return %c0_i32, %c0_i32_0, %c0_i32_1 : i32, i32, i32
  }
  func.func @transform_3(%arg0: i32) -> (i32, i32) {
    %c0_i32 = arith.constant 0 : i32
    %c0_i32_0 = arith.constant 0 : i32
    %c0_i32_1 = arith.constant 0 : i32
    return %c0_i32, %c0_i32_0 : i32, i32
  }
  func.func @transform_4(%arg0: i32) -> (i32, i32) {
    %c0_i32 = arith.constant 0 : i32
    %c0_i32_0 = arith.constant 0 : i32
    %c0_i32_1 = arith.constant 0 : i32
    return %c0_i32, %c0_i32_0 : i32, i32
  }
  func.func @transform_5(%arg0: i32) -> (i32, i32) {
    %c0_i32 = arith.constant 0 : i32
    %c0_i32_0 = arith.constant 0 : i32
    %c0_i32_1 = arith.constant 0 : i32
    return %c0_i32, %c0_i32_0 : i32, i32
  }
  func.func @transform_6(%arg0: i32) -> (i32, i32, i32) {
    %c0_i32 = arith.constant 0 : i32
    %c0_i32_0 = arith.constant 0 : i32
    %c0_i32_1 = arith.constant 0 : i32
    return %arg0, %c0_i32, %c0_i32_0 : i32, i32, i32
  }
}

</mosaic_0001>

<bundles_post_ra>
// kernel: deconv_norm_activation.1
= control target key start
LH: loop header
LB: loop body
LE: loop exit
PB: predicated region body
PF: predicated region fallthrough
CT: control target
= control target key end

     0   :  { %s3648_s21 = smov 0   ;;  %s3977_s0 = inlined_call_operand.vmem [shape: f32[2,4,342], index: 0, kind: input, shape index: {}]   ;;  %s3978_s1 = inlined_call_operand.vmem [shape: f32[9,8,4], index: 1, kind: input, shape index: {}]   ;;  %s3979_s2 = inlined_call_operand.vmem [shape: f32[9,8,8], index: 2, kind: input, shape index: {}]   ;;  %s3980_s3 = inlined_call_operand.vmem [shape: f32[8,1], index: 3, kind: input, shape index: {}]   ;;  %s3981_s4 = inlined_call_operand.vmem [shape: f32[8,1], index: 4, kind: input, shape index: {}]   ;;  %s3982_s5 = inlined_call_operand.vmem [shape: f32[1,288], index: 5, kind: input, shape index: {}]   ;;  %s3983_s6 = inlined_call_operand.vmem [shape: f32[2,8,288], index: 6, kind: output, shape index: {}]  }
   0x1 LB: > { %s3322_s22 = sadd.s32 4294967295, %s3599_s21   ;;  %p3326_p0 = scmp.ge.s32.totalorder %s3599_s21, 1  ;;  %s3599_s21 = sphi %s3648_s21, %s16_s21  }
   0x2   : > { %p212_p1 = scmp.lt.s32.totalorder %s3599_s21, 3 }
   0x4   : > { %p213_p2 = pnand %p3326_p0, %p212_p1 }
   0x5   : > { %p242_p3 = scmp.lt.s32.totalorder (!%p213_p2), %s3322_s22, 1  ;;  %v3601_v0 = vmov (!%p213_p2), 0.0   ;;  %vm3602_vm0 = vmmov (!%p213_p2), 0   ;;  %s3603_s27 = smov (!%p213_p2), 127   ;;  %v1754_v11 = vld [vmem:[%s3980_s3] sm:$0xff] (!%p213_p2)  ;;  %v3611_v12 = vmov (!%p213_p2), 0  }
   0x6   : > { %216 = sbr.rel (%p213_p2) target bundleno = 954 (0x3ba), region = 44  ;;  %3446 = vmatprep.subr.mxu1 (!%p213_p2), %v3601_v0  ;;  %1772 = vst [vmem:[#allocation2] sm:$0xff] (!%p213_p2), %v3601_v0  ;;  %344 = vmatprep.mubr.f32.mxu0 (!%p213_p2), %v3601_v0  ;;  %s3604_s28 = smov (!%p213_p2), 126   ;;  %vm273_vm1 = vcmask (!%p213_p2), 1043456   ;;  %vm266_vm2 = vcmask (!%p213_p2), 1039360   ;;  %v3329_v18 = vld [vmem:[%s3978_s1 + $0x8] sm:$0xff] (!%p213_p2) }
   0x7   : > { %3448 = vmatprep.mubr.msk.f32.mxu1 (!%p213_p2), %vm3602_vm0, %v3601_v0  ;;  %s3605_s29 = smov (!%p213_p2), 110   ;;  %s3606_s30 = smov (!%p213_p2), 109   ;;  %3590 = vset.pattern.permute.xlu0 (!%p213_p2), %v3611_v12  ;;  %vm269_vm3 = vcmask (!%p213_p2), 31744   ;;  %vm584_vm4 = vcmask (!%p213_p2), 1031168   ;;  %v254_v24 = vld [vmem:[%s3978_s1] sm:$0xff] (!%p213_p2)  ;;  %vm753_vm5 = vcmask (!%p213_p2), 900096  }
   0x8   : > { %s3607_s7 = smov (!%p213_p2), 108   ;;  %s3608_s8 = smov (!%p213_p2), 92   ;;  %3591 = vset.pattern.permute.xlu1 (!%p213_p2), %v3611_v12  ;;  %v3340_v29 = vld [vmem:[%s3978_s1 + $0x10] sm:$0xff] (!%p213_p2)  ;;  %v3346_v32 = vld [vmem:[%s3978_s1 + $0x18] sm:$0xff] (!%p213_p2)  ;;  %vm922_vm6 = vcmask (!%p213_p2), 891904   ;;  %v3352_v34 = vld [vmem:[%s3978_s1 + $0x20] sm:$0xff] (!%p213_p2) }
   0x9   : > { %s3609_s9 = smov (!%p213_p2), 91   ;;  %s3610_s10 = smov (!%p213_p2), 90   ;;  %v3358_v39 = vld [vmem:[%s3978_s1 + $0x28] sm:$0xff] (!%p213_p2)  ;;  %vm1091_vm7 = vcmask (!%p213_p2), 883712   ;;  %v3364_v46 = vld [vmem:[%s3978_s1 + $0x30] sm:$0xff] (!%p213_p2)  ;;  %vm1260_vm8 = vcmask (!%p213_p2), 752640  }
   0xa   : > { %v3370_v49 = vld [vmem:[%s3978_s1 + $0x38] sm:$0xff] (!%p213_p2)  ;;  %v3376_v53 = vld [vmem:[%s3978_s1 + $0x40] sm:$0xff] (!%p213_p2)  ;;  %vm1429_vm9 = vcmask (!%p213_p2), 744448   ;;  %vm1598_vm10 = vcmask (!%p213_p2), 736256   ;;  %s3612_s19 = smov (!%p213_p2), 19   ;;  %vm1774_vm12 = vcmask (!%p213_p2), 703488  }
   0xb   : > { %1775 = vst.msk [vmem:[#allocation2 + $0x10] sm:$0xff] (!%p213_p2), %vm1774_vm12, %v3601_v0  ;;  %vm1811_vm15 = vcmask (!%p213_p2), 1047704  }
   0xd   : > { %s3985_s22 = smov (!%p242_p3, %s3322_s22), 1 }
   0xe   : > { %s3568_s23 = smul.u32 12, %s3985_s22 }
   0xf   : > { %s3569_s18 = smul.u32 24, %s3985_s22 }
  0x10   : > { %s3665_s26 = scalar_lea.vmem %s3977_s0, %s3568_s23 }
  0x11   : > { %v3670_v1 = vld [vmem:[%s3665_s26] sm:$0xff]  ;;  %v3678_v3 = vld [vmem:[%s3665_s26 + $0x8] sm:$0xf] }
  0x12   : > { %260 = vrot.lane.b32.xlu1 %v3670_v1, %s3603_s27  ;;  %v259_v2 = vcombine.high %v3670_v1, %v3670_v1  ;;  %v572_v4 = vld [vmem:[%s3665_s26 + $0x8] sm:$0xf] }
  0x13   : > { %v741_v5 = vld [vmem:[%s3665_s26 + $0x8] sm:$0xf] }
  0x14   : > { %262 = vrot.lane.b32.xlu0 %v259_v2, %s3603_s27  ;;  %v910_v6 = vld [vmem:[%s3665_s26 + $0x8] sm:$0xf] }
  0x15   : > { %v1079_v7 = vld [vmem:[%s3665_s26 + $0x8] sm:$0xf] }
  0x16   : > { %580 = vrot.lane.b32.xlu1 %v259_v2, %s3604_s28  ;;  %v1248_v8 = vld [vmem:[%s3665_s26 + $0x8] sm:$0xf] }
  0x17   : > { %v1417_v9 = vld [vmem:[%s3665_s26 + $0x8] sm:$0xf] }
  0x18   : > { %264 = vrot.lane.b32.xlu0 %v3678_v3, %s3603_s27  ;;  %v1586_v10 = vld [vmem:[%s3665_s26 + $0x8] sm:$0xf] }
  0x1a   : > { %578 = vrot.lane.b32.xlu1 %v3670_v1, %s3604_s28 }
  0x1c   : > { %582 = vrot.lane.b32.xlu0 %v572_v4, %s3604_s28 }
  0x1e   : > { %751 = vrot.lane.b32.xlu1 %v741_v5, %s3605_s29 }
  0x20   : > { %749 = vrot.lane.b32.xlu0 %v259_v2, %s3605_s29 }
  0x22   : > { %918 = vrot.lane.b32.xlu1 %v259_v2, %s3606_s30 }
  0x24   : > { %747 = vrot.lane.b32.xlu0 %v3670_v1, %s3605_s29 }
  0x26   : > { %916 = vrot.lane.b32.xlu1 %v3670_v1, %s3606_s30 }
  0x28   : > { %920 = vrot.lane.b32.xlu0 %v910_v6, %s3606_s30 }
  0x2a   : > { %1089 = vrot.lane.b32.xlu1 %v1079_v7, %s3607_s7 }
  0x2c   : > { %1087 = vrot.lane.b32.xlu0 %v259_v2, %s3607_s7 }
  0x2e   : > { %1256 = vrot.lane.b32.xlu1 %v259_v2, %s3608_s8 }
  0x30   : > { %1085 = vrot.lane.b32.xlu0 %v3670_v1, %s3607_s7 }
  0x32   : > { %1254 = vrot.lane.b32.xlu1 %v3670_v1, %s3608_s8 }
  0x34   : > { %1258 = vrot.lane.b32.xlu0 %v1248_v8, %s3608_s8 }
  0x36   : > { %1427 = vrot.lane.b32.xlu1 %v1417_v9, %s3609_s9 }
  0x38   : > { %1425 = vrot.lane.b32.xlu0 %v259_v2, %s3609_s9 }
  0x3a   : > { %1594 = vrot.lane.b32.xlu1 %v259_v2, %s3610_s10 }
  0x3c   : > { %1423 = vrot.lane.b32.xlu0 %v3670_v1, %s3609_s9 }
  0x3e   : > { %1592 = vrot.lane.b32.xlu1 %v3670_v1, %s3610_s10 }
  0x40   : > { %1596 = vrot.lane.b32.xlu0 %v1586_v10, %s3610_s10 }
  0x44   : > { %1757 = vperm.xlu0 %3590, %v1754_v11  }
  0x84   : > { %v261_v13 = vpop.permute.xlu1 %260 }
  0x86   : > { %v263_v14 = vpop.permute.xlu0 %262 }
  0x87   : > { %v267_v19 = vsel %vm266_vm2, %v261_v13, %v263_v14 }
  0x88   : > { %v581_v15 = vpop.permute.xlu1 %580 }
  0x8a   : > { %v265_v16 = vpop.permute.xlu0 %264 }
  0x8b   : > { %3447 = vmatpush3.msk.msra.mxu1 %vm273_vm1, %v265_v16  ;;  %v268_v17 = vsel %vm266_vm2, %v263_v14, %v265_v16 }
  0x8c   : > { %3330 = vmatprep.subr.msk.mxu0 %vm273_vm1, %v268_v17  ;;  %v579_v20 = vpop.permute.xlu1 %578  ;;  %3449 = vmatmul.mubr.msk.f32.vlgmr.msra.gmra.mrb[0].mxu1 %vm269_vm3, %v3329_v18 }
  0x8d   : > { %3331 = vmatpush1.msk.msra.mxu0 %vm273_vm1, %v267_v19  ;;  %3451 = vmatprep.subr.mxu1 %v3601_v0  ;;  %v585_v26 = vsel %vm584_vm4, %v579_v20, %v581_v15  ;;  %v1778_v19 = vlaneseq }
  0x8e   : > { %3332 = vmatmul.mubr.msk.f32.vlgmr.msra.gmra.mrb[0].mxu0 %vm269_vm3, %v3329_v18  ;;  %3335 = vmatprep.subr.msk.mxu0 %vm273_vm1, %v259_v2  ;;  %v583_v21 = vpop.permute.xlu0 %582 }
  0x8f   : > { %3336 = vmatpush1.msk.msra.mxu0 %vm273_vm1, %v3670_v1  ;;  %v586_v22 = vsel %vm584_vm4, %v581_v15, %v583_v21  ;;  %494 = vmatprep.mubr.f32.mxu0 %v3601_v0 }
  0x90   : > { %3452 = vmatpush3.msk.msra.mxu1 %vm273_vm1, %v3678_v3  ;;  %3341 = vmatprep.subr.msk.mxu0 %vm273_vm1, %v586_v22  ;;  %v752_v23 = vpop.permute.xlu1 %751 }
  0x91   : > { %3453 = vmatprep.mubr.msk.f32.mxu1 %vm3602_vm0, %v3601_v0  ;;  %3456 = vmatprep.subr.mxu1 %v3601_v0 }
  0x92   : > { %3454 = vmatmul.mubr.msk.f32.vlgmr.msra.gmra.mrb[2].mxu1 %vm269_vm3, %v254_v24  ;;  %v750_v25 = vpop.permute.xlu0 %749 }
  0x93   : > { %3457 = vmatpush3.msk.msra.mxu1 %vm273_vm1, %v583_v21  ;;  %3458 = vmatprep.mubr.msk.f32.mxu1 %vm3602_vm0, %v3601_v0  ;;  %v755_v28 = vsel %vm753_vm5, %v750_v25, %v752_v23 }
  0x94   : > { %3461 = vmatprep.subr.mxu1 %v3601_v0  ;;  %v919_v27 = vpop.permute.xlu1 %918 }
  0x96   : > { %3337 = vmatmul.mubr.msk.f32.vlgmr.msra.gmra.mrb[0].mxu0 %vm269_vm3, %v254_v24  ;;  %v748_v30 = vpop.permute.xlu0 %747  ;;  %3459 = vmatmul.mubr.msk.f32.vlgmr.msra.gmra.mrb[4].mxu1 %vm269_vm3, %v3340_v29 }
  0x97   : > { %3342 = vmatpush1.msk.msra.mxu0 %vm273_vm1, %v585_v26  ;;  %660 = vmatprep.mubr.f32.mxu0 %v3601_v0  ;;  %v754_v35 = vsel %vm753_vm5, %v748_v30, %v750_v25 }
  0x98   : > { %3347 = vmatprep.subr.msk.mxu0 %vm273_vm1, %v755_v28  ;;  %3462 = vmatpush3.msk.msra.mxu1 %vm273_vm1, %v752_v23  ;;  %v917_v31 = vpop.permute.xlu1 %916  ;;  %v1779_v23 = vshrl.u32 %v1778_v19, 7  ;;  %v1776_v28 = vld [vmem:[%s3982_s5] sm:$0x7] }
  0x99   : > { %3463 = vmatprep.mubr.msk.f32.mxu1 %vm3602_vm0, %v3601_v0  ;;  %3466 = vmatprep.subr.mxu1 %v3601_v0  ;;  %v923_v42 = vsel %vm922_vm6, %v917_v31, %v919_v27 }
  0x9a   : > { %v921_v33 = vpop.permute.xlu0 %920  ;;  %3464 = vmatmul.mubr.msk.f32.vlgmr.msra.gmra.mrb[6].mxu1 %vm269_vm3, %v3346_v32  ;;  %v1788_v26 = vsub.s32 2, %v1779_v23 }
  0x9b   : > { %3467 = vmatpush3.msk.msra.mxu1 %vm273_vm1, %v921_v33  ;;  %3468 = vmatprep.mubr.msk.f32.mxu1 %vm3602_vm0, %v3601_v0  ;;  %v924_v37 = vsel %vm922_vm6, %v919_v27, %v921_v33 }
  0x9c   : > { %v1090_v36 = vpop.permute.xlu1 %1089  ;;  %3471 = vmatprep.subr.mxu1 %v3601_v0  ;;  %v1789_v31 = vrot.slane %v1776_v28, %v1788_v26 }
  0x9e   : > { %3343 = vmatmul.mubr.msk.f32.vlgmr.msra.gmra.mrb[0].mxu0 %vm269_vm3, %v3340_v29  ;;  %v1088_v38 = vpop.permute.xlu0 %1087  ;;  %3469 = vmatmul.mubr.msk.f32.vlgmr.msra.gmra.mrb[8].mxu1 %vm269_vm3, %v3352_v34 }
  0x9f   : > { %3348 = vmatpush1.msk.msra.mxu0 %vm273_vm1, %v754_v35  ;;  %829 = vmatprep.mubr.f32.mxu0 %v3601_v0  ;;  %v1093_v44 = vsel %vm1091_vm7, %v1088_v38, %v1090_v36  ;;  %v1780_v35 = vsub.s32 0, %v1779_v23 }
  0xa0   : > { %3353 = vmatprep.subr.msk.mxu0 %vm273_vm1, %v924_v37  ;;  %v1257_v40 = vpop.permute.xlu1 %1256  ;;  %3472 = vmatpush3.msk.msra.mxu1 %vm273_vm1, %v1090_v36 }
  0xa1   : > { %3473 = vmatprep.mubr.msk.f32.mxu1 %vm3602_vm0, %v3601_v0  ;;  %3476 = vmatprep.subr.mxu1 %v3601_v0 }
  0xa2   : > { %v1086_v41 = vpop.permute.xlu0 %1085  ;;  %3474 = vmatmul.mubr.msk.f32.vlgmr.msra.gmra.mrb[10].mxu1 %vm269_vm3, %v3358_v39 }
  0xa3   : > { %3478 = vmatprep.mubr.msk.f32.mxu1 %vm3602_vm0, %v3601_v0  ;;  %v1092_v50 = vsel %vm1091_vm7, %v1086_v41, %v1088_v38  ;;  %v1784_v41 = vsub.s32 1, %v1779_v23  ;;  %v3399_v23 = vld [vmem:[%s3979_s2 + $0x30] sm:$0xff] }
  0xa4   : > { %v1255_v43 = vpop.permute.xlu1 %1254 }
  0xa5   : > { %v1261_v55 = vsel %vm1260_vm8, %v1255_v43, %v1257_v40 }
  0xa6   : > { %3349 = vmatmul.mubr.msk.f32.vlgmr.msra.gmra.mrb[0].mxu0 %vm269_vm3, %v3346_v32  ;;  %v1259_v45 = vpop.permute.xlu0 %1258 }
  0xa7   : > { %3354 = vmatpush1.msk.msra.mxu0 %vm273_vm1, %v923_v42  ;;  %998 = vmatprep.mubr.f32.mxu0 %v3601_v0  ;;  %v1262_v51 = vsel %vm1260_vm8, %v1257_v40, %v1259_v45  ;;  %v1781_v40 = vrot.slane %v1776_v28, %v1780_v35  ;;  %v3405_v35 = vld [vmem:[%s3979_s2 + $0x40] sm:$0xff] }
  0xa8   : > { %3359 = vmatprep.subr.msk.mxu0 %vm273_vm1, %v1093_v44  ;;  %3477 = vmatpush3.msk.msra.mxu1 %vm273_vm1, %v1259_v45  ;;  %v1428_v47 = vpop.permute.xlu1 %1427 }
  0xa9   : > { %3479 = vmatmul.mubr.msk.f32.vlgmr.msra.gmra.mrb[12].mxu1 %vm269_vm3, %v3364_v46  ;;  %3481 = vmatprep.subr.mxu1 %v3601_v0 }
  0xaa   : > { %v1426_v48 = vpop.permute.xlu0 %1425  ;;  %3482 = vmatpush3.msk.msra.mxu1 %vm273_vm1, %v1428_v47  ;;  %3483 = vmatprep.mubr.msk.f32.mxu1 %vm3602_vm0, %v3601_v0 }
  0xab   : > { %3486 = vmatprep.subr.mxu1 %v3601_v0  ;;  %v1431_v56 = vsel %vm1429_vm9, %v1426_v48, %v1428_v47 }
  0xac   : > { %v1595_v57 = vpop.permute.xlu1 %1594 }
  0xad   : > { %3484 = vmatmul.mubr.msk.f32.vlgmr.msra.gmra.mrb[14].mxu1 %vm269_vm3, %v3370_v49 }
  0xae   : > { %3355 = vmatmul.mubr.msk.f32.vlgmr.msra.gmra.mrb[0].mxu0 %vm269_vm3, %v3352_v34  ;;  %v1424_v52 = vpop.permute.xlu0 %1423  ;;  %3488 = vmatprep.mubr.msk.f32.mxu1 %vm3602_vm0, %v3601_v0 }
  0xaf   : > { %3360 = vmatpush1.msk.msra.mxu0 %vm273_vm1, %v1092_v50  ;;  %1167 = vmatprep.mubr.f32.mxu0 %v3601_v0  ;;  %v1430_v58 = vsel %vm1429_vm9, %v1424_v52, %v1426_v48 }
  0xb0   : > { %3365 = vmatprep.subr.msk.mxu0 %vm273_vm1, %v1262_v51  ;;  %v1593_v60 = vpop.permute.xlu1 %1592 }
  0xb1   : > { %v1599_v61 = vsel %vm1598_vm10, %v1593_v60, %v1595_v57  ;;  %v3382_v60 = vld [vmem:[%s3979_s2 + $0x8] sm:$0xff] }
  0xb2   : > { %v1597_v54 = vpop.permute.xlu0 %1596 }
  0xb3   : > { %3487 = vmatpush3.msk.msra.mxu1 %vm273_vm1, %v1597_v54  ;;  %v1600_v59 = vsel %vm1598_vm10, %v1595_v57, %v1597_v54 }
  0xb4   : > { %3489 = vmatmul.mubr.msk.f32.vlgmr.msra.gmra.mrb[16].mxu1 %vm269_vm3, %v3376_v53  ;;  %3491 = vmatprep.subr.mxu1 %v3601_v0 }
  0xb5   : > { %3493 = vmatprep.mubr.msk.f32.mxu1 %vm3602_vm0, %v3601_v0 }
  0xb6   : > { %3361 = vmatmul.mubr.msk.f32.vlgmr.msra.gmra.mrb[0].mxu0 %vm269_vm3, %v3358_v39 }
  0xb7   : > { %3366 = vmatpush1.msk.msra.mxu0 %vm273_vm1, %v1261_v55  ;;  %1336 = vmatprep.mubr.f32.mxu0 %v3601_v0 }
  0xb8   : > { %3371 = vmatprep.subr.msk.mxu0 %vm273_vm1, %v1431_v56  ;;  %v3245_v56 = vld [vmem:[%s3981_s4] sm:$0xff] }
  0xbe   : > { %3367 = vmatmul.mubr.msk.f32.vlgmr.msra.gmra.mrb[0].mxu0 %vm269_vm3, %v3364_v46  ;;  %v1785_v46 = vrot.slane %v1776_v28, %v1784_v41 }
  0xbf   : > { %3372 = vmatpush1.msk.msra.mxu0 %vm273_vm1, %v1430_v58  ;;  %1505 = vmatprep.mubr.f32.mxu0 %v3601_v0 }
  0xc0   : > { %3377 = vmatprep.subr.msk.mxu0 %vm273_vm1, %v1600_v59 }
  0xc3   : > { %v1758_v25 = vpop.permute.xlu0 %1757 }
  0xc6   : > { %3373 = vmatmul.mubr.msk.f32.vlgmr.msra.gmra.mrb[0].mxu0 %vm269_vm3, %v3370_v49 }
  0xc7   : > { %3378 = vmatpush1.msk.msra.mxu0 %vm273_vm1, %v1599_v61  ;;  %1674 = vmatprep.mubr.f32.mxu0 %v3601_v0  ;;  %vm1805_vm1 = vcmask 154624  }
  0xce   : > { %3379 = vmatmul.mubr.msk.f32.vlgmr.msra.gmra.mrb[0].mxu0 %vm269_vm3, %v3376_v53  ;;  %vm1814_vm3 = vcmask 416768  }
  0xcf   : > { %1904 = vmatprep.mubr.f32.mxu0 %v3601_v0 }
 0x15f   : > { %v417_v62 = vpop.f32.mrb[0].mxu1 }
 0x160   : > { %v3450_v63 = vpop.f32.mrb[1].mxu1 }
 0x165   : > { %v567_v1 = vpop.f32.mrb[2].mxu1 }
 0x166   : > { %v568_v2 = vadd.f32 %v567_v1, %v417_v62  ;;  %v3455_v3 = vpop.f32.mrb[3].mxu1 }
 0x169   : > { %v733_v4 = vpop.f32.mrb[4].mxu1 }
 0x16a   : > { %v739_v5 = vadd.f32 %v733_v4, %v568_v2  ;;  %v3460_v6 = vpop.f32.mrb[5].mxu1  ;;  %v1819_v2 = vld [vmem:[%s3979_s2] sm:$0xff] }
 0x16b   : > { %v3387_v6 = vld [vmem:[%s3979_s2 + $0x10] sm:$0xff] }
 0x16d   : > { %v902_v7 = vpop.f32.mrb[6].mxu1 }
 0x16e   : > { %v908_v8 = vadd.f32 %v902_v7, %v739_v5  ;;  %v3465_v9 = vpop.f32.mrb[7].mxu1 }
 0x171   : > { %v1071_v10 = vpop.f32.mrb[8].mxu1 }
 0x172   : > { %v1077_v11 = vadd.f32 %v1071_v10, %v908_v8  ;;  %v3470_v12 = vpop.f32.mrb[9].mxu1 }
 0x175   : > { %v1240_v13 = vpop.f32.mrb[10].mxu1 }
 0x176   : > { %v1246_v14 = vadd.f32 %v1240_v13, %v1077_v11  ;;  %v3475_v15 = vpop.f32.mrb[11].mxu1  ;;  %v3390_v11 = vld [vmem:[%s3979_s2 + $0x18] sm:$0xff] }
 0x177   : > { %v3393_v15 = vld [vmem:[%s3979_s2 + $0x20] sm:$0xff] }
 0x17c   : > { %v1409_v16 = vpop.f32.mrb[12].mxu1 }
 0x17d   : > { %v1415_v17 = vadd.f32 %v1409_v16, %v1246_v14  ;;  %v3480_v18 = vpop.f32.mrb[13].mxu1 }
 0x180   : > { %v1578_v20 = vpop.f32.mrb[14].mxu1 }
 0x181   : > { %v1584_v21 = vadd.f32 %v1578_v20, %v1415_v17  ;;  %v3485_v22 = vpop.f32.mrb[15].mxu1  ;;  %v3396_v20 = vld [vmem:[%s3979_s2 + $0x28] sm:$0xff] }
 0x187   : > { %v1747_v24 = vpop.f32.mrb[16].mxu1 }
 0x188   : > { %v1753_v27 = vadd.f32 %v1747_v24, %v1584_v21  ;;  %v3490_v29 = vpop.f32.mrb[17].mxu1 }
 0x18a   : > { %v1762_v30 = vadd.f32 %v1758_v25, %v1753_v27 }
 0x18c   : > { %v1768_v32 = vmul.f32 0.01, %v1762_v30  ;;  %vm1765_vm11 = vcmp.gt.f32.partialorder %v1762_v30, 0.0 }
 0x18e   : > { %v1771_v33 = vsel %vm1765_vm11, %v1762_v30, %v1768_v32  ;;  %vm1836_vm11 = vcmask 64512   ;;  %v3402_v32 = vld [vmem:[%s3979_s2 + $0x38] sm:$0xff] }
 0x18f   : > { %v1795_v34 = vmul.f32 %v1789_v31, %v1771_v33 }
 0x191   : > { %1803 = vrot.lane.b32.xlu0 %v1795_v34, %s3612_s19 }
 0x1a1   : > { %v1676_v36 = vpop.f32.mrb[0].mxu0 }
 0x1a2   : > { %v1760_v37 = vadd.f32 %v1758_v25, %v1676_v36  ;;  %v1678_v38 = vpop.f32.mrb[1].mxu0 }
 0x1a3   : > { %v1761_v39 = vadd.f32 %v1758_v25, %v1678_v38 }
 0x1a4   : > { %vm1763_vm13 = vcmp.gt.f32.partialorder %v1760_v37, 0.0  ;;  %v1766_v42 = vmul.f32 0.01, %v1760_v37 }
 0x1a5   : > { %vm1764_vm14 = vcmp.gt.f32.partialorder %v1761_v39, 0.0  ;;  %v1767_v43 = vmul.f32 0.01, %v1761_v39 }
 0x1a6   : > { %v1769_v44 = vsel %vm1763_vm13, %v1760_v37, %v1766_v42 }
 0x1a7   : > { %v1793_v45 = vmul.f32 %v1781_v40, %v1769_v44  ;;  %v1770_v47 = vsel %vm1764_vm14, %v1761_v39, %v1767_v43 }
 0x1a8   : > { %v1794_v48 = vmul.f32 %v1785_v46, %v1770_v47 }
 0x1a9   : > { %1799 = vrot.lane.b32.xlu1 %v1793_v45, %s3612_s19 }
 0x1ad   : > { %1801 = vrot.lane.b32.xlu1 %v1794_v48, %s3612_s19 }
 0x203   : > { %v1804_v50 = vpop.permute.xlu0 %1803 }
 0x21b   : > { %v1800_v49 = vpop.permute.xlu1 %1799 }
 0x21c   : > { %1812 = vst.msk [vmem:[#allocation2] sm:$0xff] %vm1811_vm15, %v1800_v49 }
 0x21f   : > { %v1802_v51 = vpop.permute.xlu1 %1801 }
 0x220   : > { %v1806_v52 = vsel %vm1805_vm1, %v1800_v49, %v1802_v51  ;;  %v1807_v53 = vsel %vm1805_vm1, %v1802_v51, %v1804_v50 }
 0x221   : > { %1815 = vst.msk [vmem:[#allocation2 + $0x10] sm:$0xff] %vm1814_vm3, %v1807_v53  ;;  %1827 = vrot.lane.b32.xlu1 %v1806_v52, %s3603_s27 }
 0x223   : > { %v1816_v54 = vld [vmem:[#allocation2] sm:$0xff] }
 0x225   : > { %1825 = vrot.lane.b32.xlu1 %v1816_v54, %s3603_s27 }
 0x228   : > { %v1818_v55 = vld [vmem:[#allocation2 + $0x10] sm:$0xff] }
 0x229   : > { %1829 = vrot.lane.b32.xlu0 %v1818_v55, %s3603_s27  ;;  %2131 = vrot.lane.b32.xlu1 %v1818_v55, %s3604_s28 }
 0x22d   : > { %2129 = vrot.lane.b32.xlu0 %v1806_v52, %s3604_s28  ;;  %2289 = vrot.lane.b32.xlu1 %v1806_v52, %s3605_s29 }
 0x231   : > { %2127 = vrot.lane.b32.xlu0 %v1816_v54, %s3604_s28  ;;  %2287 = vrot.lane.b32.xlu1 %v1816_v54, %s3605_s29  ;;  %s251_s28 = scalar_lea.vmem %s3983_s6, %s3569_s18 }
 0x235   : > { %2291 = vrot.lane.b32.xlu0 %v1818_v55, %s3605_s29  ;;  %2451 = vrot.lane.b32.xlu1 %v1818_v55, %s3606_s30 }
 0x239   : > { %2449 = vrot.lane.b32.xlu0 %v1806_v52, %s3606_s30  ;;  %2609 = vrot.lane.b32.xlu1 %v1806_v52, %s3607_s7 }
 0x23d   : > { %2447 = vrot.lane.b32.xlu0 %v1816_v54, %s3606_s30  ;;  %2607 = vrot.lane.b32.xlu1 %v1816_v54, %s3607_s7 }
 0x241   : > { %2611 = vrot.lane.b32.xlu0 %v1818_v55, %s3607_s7  ;;  %2771 = vrot.lane.b32.xlu1 %v1818_v55, %s3608_s8 }
 0x245   : > { %2769 = vrot.lane.b32.xlu0 %v1806_v52, %s3608_s8  ;;  %2929 = vrot.lane.b32.xlu1 %v1806_v52, %s3609_s9 }
 0x249   : > { %2767 = vrot.lane.b32.xlu0 %v1816_v54, %s3608_s8  ;;  %2927 = vrot.lane.b32.xlu1 %v1816_v54, %s3609_s9 }
 0x24d   : > { %2931 = vrot.lane.b32.xlu0 %v1818_v55, %s3609_s9  ;;  %3091 = vrot.lane.b32.xlu1 %v1818_v55, %s3610_s10 }
 0x251   : > { %3089 = vrot.lane.b32.xlu0 %v1806_v52, %s3610_s10  ;;  %3248 = vperm.xlu1 %3591, %v3245_v56  }
 0x255   : > { %3087 = vrot.lane.b32.xlu0 %v1816_v54, %s3610_s10 }
 0x293   : > { %v1828_v57 = vpop.permute.xlu1 %1827 }
 0x297   : > { %v1826_v58 = vpop.permute.xlu1 %1825 }
 0x298   : > { %v1831_v63 = vsel %vm266_vm2, %v1826_v58, %v1828_v57 }
 0x29b   : > { %v1830_v59 = vpop.permute.xlu0 %1829  ;;  %v2132_v61 = vpop.permute.xlu1 %2131 }
 0x29c   : > { %3492 = vmatpush3.msra.mxu1 %v1830_v59  ;;  %v1832_v62 = vsel %vm266_vm2, %v1828_v57, %v1830_v59  ;;  %vm3265_vm2 = vcmask 261120  }
 0x29d   : > { %1840 = vmatprep.subr.mxu0 %v1832_v62  ;;  %3496 = vmatprep.subr.mxu1 %v3601_v0 }
 0x29e   : > { %3494 = vmatmul.mubr.msk.f32.vlgmr.msra.gmra.mrb[18].mxu1 %vm1836_vm11, %v3382_v60  ;;  %1841 = vmatpush1.msra.mxu0 %v1831_v63 }
 0x29f   : > { %3497 = vmatpush3.msra.mxu1 %v1818_v55  ;;  %v2130_v1 = vpop.permute.xlu0 %2129  ;;  %3383 = vmatmul.mubr.msk.f32.vlgmr.msra.gmra.mrb[2].mxu0 %vm1836_vm11, %v3382_v60  ;;  %v2290_v3 = vpop.permute.xlu1 %2289 }
 0x2a0   : > { %1984 = vmatprep.subr.mxu0 %v1806_v52  ;;  %3498 = vmatprep.mubr.msk.f32.mxu1 %vm3602_vm0, %v3601_v0  ;;  %v2134_v4 = vsel %vm584_vm4, %v2130_v1, %v2132_v61 }
 0x2a1   : > { %3501 = vmatprep.subr.mxu1 %v3601_v0  ;;  %1985 = vmatpush1.msra.mxu0 %v1816_v54 }
 0x2a2   : > { %3499 = vmatmul.mubr.msk.f32.vlgmr.msra.gmra.mrb[20].mxu1 %vm1836_vm11, %v1819_v2  ;;  %2141 = vmatprep.subr.mxu0 %v2134_v4 }
 0x2a3   : > { %v2128_v5 = vpop.permute.xlu0 %2127  ;;  %3502 = vmatpush3.msra.mxu1 %v2132_v61  ;;  %3503 = vmatprep.mubr.msk.f32.mxu1 %vm3602_vm0, %v3601_v0  ;;  %v2288_v7 = vpop.permute.xlu1 %2287 }
 0x2a4   : > { %3506 = vmatprep.subr.mxu1 %v3601_v0  ;;  %2048 = vmatprep.mubr.f32.mxu0 %v3601_v0  ;;  %v2133_v8 = vsel %vm584_vm4, %v2128_v5, %v2130_v1  ;;  %v2293_v16 = vsel %vm753_vm5, %v2288_v7, %v2290_v3 }
 0x2a6   : > { %3504 = vmatmul.mubr.msk.f32.vlgmr.msra.gmra.mrb[22].mxu1 %vm1836_vm11, %v3387_v6 }
 0x2a7   : > { %v2292_v9 = vpop.permute.xlu0 %2291  ;;  %3385 = vmatmul.mubr.msk.f32.vlgmr.msra.gmra.mrb[2].mxu0 %vm1836_vm11, %v1819_v2  ;;  %3508 = vmatprep.mubr.msk.f32.mxu1 %vm3602_vm0, %v3601_v0  ;;  %v2452_v10 = vpop.permute.xlu1 %2451 }
 0x2a8   : > { %3507 = vmatpush3.msra.mxu1 %v2292_v9  ;;  %2142 = vmatpush1.msra.mxu0 %v2133_v8  ;;  %v2294_v12 = vsel %vm753_vm5, %v2290_v3, %v2292_v9 }
 0x2a9   : > { %2301 = vmatprep.subr.mxu0 %v2294_v12  ;;  %3511 = vmatprep.subr.mxu1 %v3601_v0 }
 0x2aa   : > { %3509 = vmatmul.mubr.msk.f32.vlgmr.msra.gmra.mrb[24].mxu1 %vm1836_vm11, %v3390_v11  ;;  %2205 = vmatprep.mubr.f32.mxu0 %v3601_v0 }
 0x2ab   : > { %v2450_v13 = vpop.permute.xlu0 %2449  ;;  %3512 = vmatpush3.msra.mxu1 %v2452_v10  ;;  %3513 = vmatprep.mubr.msk.f32.mxu1 %vm3602_vm0, %v3601_v0  ;;  %v2610_v14 = vpop.permute.xlu1 %2609 }
 0x2ac   : > { %3516 = vmatprep.subr.mxu1 %v3601_v0  ;;  %v2454_v19 = vsel %vm922_vm6, %v2450_v13, %v2452_v10 }
 0x2ae   : > { %3514 = vmatmul.mubr.msk.f32.vlgmr.msra.gmra.mrb[26].mxu1 %vm1836_vm11, %v3393_v15 }
 0x2af   : > { %v2448_v17 = vpop.permute.xlu0 %2447  ;;  %3388 = vmatmul.mubr.msk.f32.vlgmr.msra.gmra.mrb[2].mxu0 %vm1836_vm11, %v3387_v6  ;;  %v2608_v18 = vpop.permute.xlu1 %2607  ;;  %3518 = vmatprep.mubr.msk.f32.mxu1 %vm3602_vm0, %v3601_v0 }
 0x2b0   : > { %2302 = vmatpush1.msra.mxu0 %v2293_v16  ;;  %2365 = vmatprep.mubr.f32.mxu0 %v3601_v0  ;;  %v2453_v24 = vsel %vm922_vm6, %v2448_v17, %v2450_v13  ;;  %v2613_v30 = vsel %vm1091_vm7, %v2608_v18, %v2610_v14 }
 0x2b1   : > { %2461 = vmatprep.subr.mxu0 %v2454_v19 }
 0x2b3   : > { %v2612_v21 = vpop.permute.xlu0 %2611  ;;  %v2772_v22 = vpop.permute.xlu1 %2771 }
 0x2b4   : > { %3517 = vmatpush3.msra.mxu1 %v2612_v21  ;;  %v2614_v27 = vsel %vm1091_vm7, %v2610_v14, %v2612_v21 }
 0x2b5   : > { %3521 = vmatprep.subr.mxu1 %v3601_v0  ;;  %3519 = vmatmul.mubr.msk.f32.vlgmr.msra.gmra.mrb[28].mxu1 %vm1836_vm11, %v3396_v20 }
 0x2b6   : > { %3522 = vmatpush3.msra.mxu1 %v2772_v22  ;;  %3523 = vmatprep.mubr.msk.f32.mxu1 %vm3602_vm0, %v3601_v0 }
 0x2b7   : > { %v2770_v25 = vpop.permute.xlu0 %2769  ;;  %3391 = vmatmul.mubr.msk.f32.vlgmr.msra.gmra.mrb[2].mxu0 %vm1836_vm11, %v3390_v11  ;;  %3526 = vmatprep.subr.mxu1 %v3601_v0  ;;  %v2930_v26 = vpop.permute.xlu1 %2929 }
 0x2b8   : > { %2462 = vmatpush1.msra.mxu0 %v2453_v24  ;;  %2525 = vmatprep.mubr.f32.mxu0 %v3601_v0  ;;  %v2774_v33 = vsel %vm1260_vm8, %v2770_v25, %v2772_v22 }
 0x2b9   : > { %2621 = vmatprep.subr.mxu0 %v2614_v27  ;;  %3524 = vmatmul.mubr.msk.f32.vlgmr.msra.gmra.mrb[30].mxu1 %vm1836_vm11, %v3399_v23 }
 0x2ba   : > { %3528 = vmatprep.mubr.msk.f32.mxu1 %vm3602_vm0, %v3601_v0 }
 0x2bb   : > { %v2768_v28 = vpop.permute.xlu0 %2767  ;;  %v2928_v29 = vpop.permute.xlu1 %2927 }
 0x2bc   : > { %v2773_v36 = vsel %vm1260_vm8, %v2768_v28, %v2770_v25  ;;  %v2933_v39 = vsel %vm1429_vm9, %v2928_v29, %v2930_v26 }
 0x2bf   : > { %v2932_v31 = vpop.permute.xlu0 %2931  ;;  %3394 = vmatmul.mubr.msk.f32.vlgmr.msra.gmra.mrb[2].mxu0 %vm1836_vm11, %v3393_v15  ;;  %v3092_v34 = vpop.permute.xlu1 %3091 }
 0x2c0   : > { %3527 = vmatpush3.msra.mxu1 %v2932_v31  ;;  %2622 = vmatpush1.msra.mxu0 %v2613_v30  ;;  %v2934_v37 = vsel %vm1429_vm9, %v2930_v26, %v2932_v31 }
 0x2c1   : > { %2781 = vmatprep.subr.mxu0 %v2774_v33  ;;  %3531 = vmatprep.subr.mxu1 %v3601_v0 }
 0x2c2   : > { %3529 = vmatmul.mubr.msk.f32.vlgmr.msra.gmra.mrb[32].mxu1 %vm1836_vm11, %v3402_v32  ;;  %2685 = vmatprep.mubr.f32.mxu0 %v3601_v0 }
 0x2c3   : > { %3532 = vmatpush3.msra.mxu1 %v3092_v34  ;;  %3533 = vmatprep.mubr.msk.f32.mxu1 %vm3602_vm0, %v3601_v0  ;;  %v3090_v38 = vpop.permute.xlu0 %3089 }
 0x2c4   : > { %v3094_v40 = vsel %vm1598_vm10, %v3090_v38, %v3092_v34 }
 0x2c6   : > { %3534 = vmatmul.mubr.msk.f32.vlgmr.msra.gmra.mrb[34].mxu1 %vm1836_vm11, %v3405_v35 }
 0x2c7   : > { %3397 = vmatmul.mubr.msk.f32.vlgmr.msra.gmra.mrb[2].mxu0 %vm1836_vm11, %v3396_v20  ;;  %v3088_v41 = vpop.permute.xlu0 %3087 }
 0x2c8   : > { %2782 = vmatpush1.msra.mxu0 %v2773_v36  ;;  %2845 = vmatprep.mubr.f32.mxu0 %v3601_v0  ;;  %v3093_v42 = vsel %vm1598_vm10, %v3088_v41, %v3090_v38 }
 0x2c9   : > { %2941 = vmatprep.subr.mxu0 %v2934_v37 }
 0x2cf   : > { %3400 = vmatmul.mubr.msk.f32.vlgmr.msra.gmra.mrb[2].mxu0 %vm1836_vm11, %v3399_v23 }
 0x2d0   : > { %2942 = vmatpush1.msra.mxu0 %v2933_v39  ;;  %3005 = vmatprep.mubr.f32.mxu0 %v3601_v0  ;;  %v3249_v3 = vpop.permute.xlu1 %3248 }
 0x2d1   : > { %3101 = vmatprep.subr.mxu0 %v3094_v40 }
 0x2d7   : > { %3403 = vmatmul.mubr.msk.f32.vlgmr.msra.gmra.mrb[2].mxu0 %vm1836_vm11, %v3402_v32 }
 0x2d8   : > { %3102 = vmatpush1.msra.mxu0 %v3093_v42  ;;  %3165 = vmatprep.mubr.f32.mxu0 %v3601_v0 }
 0x2df   : > { %3406 = vmatmul.mubr.msk.f32.vlgmr.msra.gmra.mrb[2].mxu0 %vm1836_vm11, %v3405_v35 }
 0x371   : > { %v1977_v43 = vpop.f32.mrb[18].mxu1 }
 0x372   : > { %v3495_v44 = vpop.f32.mrb[19].mxu1 }
 0x375   : > { %v2121_v45 = vpop.f32.mrb[20].mxu1 }
 0x376   : > { %v2122_v46 = vadd.f32 %v2121_v45, %v1977_v43  ;;  %v3500_v47 = vpop.f32.mrb[21].mxu1 }
 0x379   : > { %v2278_v48 = vpop.f32.mrb[22].mxu1 }
 0x37a   : > { %v2284_v49 = vadd.f32 %v2278_v48, %v2122_v46  ;;  %v3505_v50 = vpop.f32.mrb[23].mxu1 }
 0x37d   : > { %v2438_v51 = vpop.f32.mrb[24].mxu1 }
 0x37e   : > { %v2444_v52 = vadd.f32 %v2438_v51, %v2284_v49  ;;  %v3510_v53 = vpop.f32.mrb[25].mxu1 }
 0x381   : > { %v2598_v54 = vpop.f32.mrb[26].mxu1 }
 0x382   : > { %v2604_v55 = vadd.f32 %v2598_v54, %v2444_v52  ;;  %v3515_v56 = vpop.f32.mrb[27].mxu1 }
 0x388   : > { %v2758_v57 = vpop.f32.mrb[28].mxu1 }
 0x389   : > { %v2764_v58 = vadd.f32 %v2758_v57, %v2604_v55  ;;  %v3520_v0 = vpop.f32.mrb[29].mxu1 }
 0x38c   : > { %v2918_v59 = vpop.f32.mrb[30].mxu1 }
 0x38d   : > { %v2924_v60 = vadd.f32 %v2918_v59, %v2764_v58  ;;  %v3525_v61 = vpop.f32.mrb[31].mxu1 }
 0x395   : > { %v3078_v62 = vpop.f32.mrb[32].mxu1 }
 0x396   : > { %v3084_v63 = vadd.f32 %v3078_v62, %v2924_v60  ;;  %v3530_v1 = vpop.f32.mrb[33].mxu1 }
 0x399   : > { %v3238_v2 = vpop.f32.mrb[34].mxu1 }
 0x39a   : > { %v3244_v4 = vadd.f32 %v3238_v2, %v3084_v63  ;;  %v3535_v5 = vpop.f32.mrb[35].mxu1 }
 0x39c   : > { %v3253_v6 = vadd.f32 %v3249_v3, %v3244_v4 }
 0x39e   : > { %vm3256_vm0 = vcmp.gt.f32.partialorder %v3253_v6, 0.0  ;;  %v3259_v7 = vmul.f32 0.01, %v3253_v6 }
 0x3a0   : > { %v3262_v8 = vsel %vm3256_vm0, %v3253_v6, %v3259_v7 }
 0x3a1   : > { %3266 = vst.msk [vmem:[%s251_s28 + $0x10] sm:$0xff] %vm3265_vm2, %v3262_v8 }
 0x3b2   : > { %v3167_v9 = vpop.f32.mrb[2].mxu0 }
 0x3b3   : > { %v3251_v10 = vadd.f32 %v3249_v3, %v3167_v9  ;;  %v3169_v11 = vpop.f32.mrb[3].mxu0 }
 0x3b4   : > { %v3252_v12 = vadd.f32 %v3249_v3, %v3169_v11 }
 0x3b5   : > { %vm3254_vm4 = vcmp.gt.f32.partialorder %v3251_v10, 0.0  ;;  %v3257_v13 = vmul.f32 0.01, %v3251_v10 }
 0x3b6   : > { %vm3255_vm5 = vcmp.gt.f32.partialorder %v3252_v12, 0.0  ;;  %v3258_v14 = vmul.f32 0.01, %v3252_v12 }
 0x3b7   : > { %v3260_v15 = vsel %vm3254_vm4, %v3251_v10, %v3257_v13 }
 0x3b8   : > { %3263 = vst [vmem:[%s251_s28] sm:$0xff] %v3260_v15  ;;  %v3261_v16 = vsel %vm3255_vm5, %v3252_v12, %v3258_v14 }
 0x3b9   : > { %3264 = vst [vmem:[%s251_s28 + $0x8] sm:$0xff] %v3261_v16 }
 0x3ba PF: > { %s16_s21 = sadd.s32 1, %s3599_s21  }
 0x3bb   : > { %p13_p4 = scmp.ge.s32.totalorder %s16_s21, 4  }
 0x3bd   :  { %15 = sbr.rel (!%p13_p4) target bundleno = 1 (0x1), region = 90 }

</bundles_post_ra>
